<compile_context>
chip_gen: v6e
topology: v6e:2x2x1
jax: 0.10.0
libtpu: 0.0.40
codegen_flags: <defaults>
</compile_context>

<pallas_src>
import jax
import jax.numpy as jnp
from jax.experimental import pallas as pl
import numpy as np

# ---------------- problem sizes (small, consistent with the module) ----------------
B = 2            # batch
TOKEN_CNT = 4    # input_dim = cfg.io_format.token_cnt
SEQ_LEN = 15     # chosen so token_cnt * (seq_len - 10) == token_cnt * 5 (l_out in-dim)
HIDDEN = 32      # cfg.encoder.size_hidden
Z = 8            # cfg.z_size

C1, K1 = TOKEN_CNT * 4, 2     # l1: Conv1d(4, 16, k=2)
C2, K2 = TOKEN_CNT * 2, 3     # l2: Conv1d(16, 8, k=3)
C3, K3 = TOKEN_CNT * 2, 4     # l3: Conv1d(8, 8, k=4)
C4, K4 = TOKEN_CNT, 5         # l4: Conv1d(8, 4, k=5)

L0 = SEQ_LEN
L1 = L0 - K1 + 1              # 14
L2 = L1 - K2 + 1              # 12
L3 = L2 - K3 + 1              # 9
L4 = L3 - K4 + 1              # 5
FLAT = C4 * L4                # 20 (l_out input dim)

# packed-bias lane offsets
OFF_B1 = 0
OFF_B2 = OFF_B1 + C1          # 16
OFF_B3 = OFF_B2 + C2          # 24
OFF_B4 = OFF_B3 + C3          # 32
OFF_BOUT = OFF_B4 + C4        # 36
OFF_BHEAD = OFF_BOUT + HIDDEN # 68
BIAS_LEN = OFF_BHEAD + 2 * Z  # 84


# ---------------- Pallas kernel: full forward for the whole batch ----------------
def encoder_kernel(x_ref, w1_ref, w2_ref, w3_ref, w4_ref, wout_ref, whead_ref,
                   bias_ref, out_ref):
    bias = bias_ref[...]                                   # (1, BIAS_LEN)

    def im2col(h, l_in, k, l_out):
        # h: (B*l_in, C) -> (B*l_out, k*C); taps concatenated on lanes,
        # batches stacked back along sublanes (windows never cross batch boundaries).
        per_batch = []
        for bi in range(B):
            base = bi * l_in
            per_batch.append(jnp.concatenate(
                [h[base + kk: base + kk + l_out, :] for kk in range(k)], axis=-1))
        return per_batch[0] if B == 1 else jnp.concatenate(per_batch, axis=0)

    def conv_relu(h, l_in, k, l_out, w_ref, b_off, c_out):
        cols = im2col(h, l_in, k, l_out)                   # (B*l_out, k*C_in)
        y = jnp.dot(cols, w_ref[...], preferred_element_type=jnp.float32)
        y = y + bias[:, b_off:b_off + c_out]
        return jnp.maximum(y, 0.0)

    x = x_ref[...]                                         # (B*L0, TOKEN_CNT)
    h1 = conv_relu(x,  L0, K1, L1, w1_ref, OFF_B1, C1)     # (B*14, 16)
    h2 = conv_relu(h1, L1, K2, L2, w2_ref, OFF_B2, C2)     # (B*12, 8)
    h3 = conv_relu(h2, L2, K3, L3, w3_ref, OFF_B3, C3)     # (B*9,  8)
    h4 = conv_relu(h3, L3, K4, L4, w4_ref, OFF_B4, C4)     # (B*5,  4)

    # channel-major flatten + l_out as ONE matmul (permutation folded into wout_ref)
    flat = im2col(h4, L4, L4, 1)                           # (B, L4*C4) = (B, FLAT)
    h = jnp.dot(flat, wout_ref[...], preferred_element_type=jnp.float32)
    h = jnp.maximum(h + bias[:, OFF_BOUT:OFF_BOUT + HIDDEN], 0.0)   # (B, HIDDEN)

    # fused mu / sigma heads: one (HIDDEN, 2Z) matmul, lane-dense (B, 2Z) output
    head = jnp.dot(h, whead_ref[...], preferred_element_type=jnp.float32)
    head = head + bias[:, OFF_BHEAD:OFF_BHEAD + 2 * Z]               # (B, 2Z)
    # numerically-stable softplus (matches PyTorch Softplus threshold=20 behaviour)
    sp = jnp.where(head > 20.0, head,
                   jnp.log1p(jnp.exp(jnp.minimum(head, 20.0))))
    lane = jax.lax.broadcasted_iota(jnp.int32, head.shape, 1)
    out_ref[...] = jnp.where(lane < Z, head, sp)           # [ mu | softplus(sigma_lin) ]


@jax.jit
def encoder_forward(x, params):
    """x: (B, SEQ_LEN, TOKEN_CNT) float32 -> (mu, sigma), each (B, Z)."""
    (w1, b1, w2, b2, w3, b3, w4, b4, wout, bout, wmu, bmu, wsig, bsig) = params

    # ---- glue: pre-transpose / pack weights so the kernel only does x @ W ----
    # conv weights: (Cout, Cin, K) -> im2col layout (K*Cin, Cout), row index = k*Cin + c
    w1s = jnp.transpose(w1, (2, 1, 0)).reshape(K1 * TOKEN_CNT, C1)
    w2s = jnp.transpose(w2, (2, 1, 0)).reshape(K2 * C1, C2)
    w3s = jnp.transpose(w3, (2, 1, 0)).reshape(K3 * C2, C3)
    w4s = jnp.transpose(w4, (2, 1, 0)).reshape(K4 * C3, C4)
    # l_out weight: PyTorch flatten is channel-major (c*L4 + t); kernel flatten is (t*C4 + c)
    wouts = jnp.transpose(wout.reshape(HIDDEN, C4, L4), (2, 1, 0)).reshape(FLAT, HIDDEN)
    # fused heads: (HIDDEN, 2Z) = [Wmu^T | Wsig^T]
    whead = jnp.concatenate([wmu.T, wsig.T], axis=1)
    # all biases packed into a single lane-major array (one DMA instead of seven)
    biases = jnp.concatenate([b1, b2, b3, b4, bout, bmu, bsig]).reshape(1, BIAS_LEN)

    x2d = x.reshape(B * L0, TOKEN_CNT).astype(jnp.float32)

    out = pl.pallas_call(
        encoder_kernel,
        out_shape=jax.ShapeDtypeStruct((B, 2 * Z), jnp.float32),
    )(x2d, w1s, w2s, w3s, w4s, wouts, whead, biases)

    return out[:, :Z], out[:, Z:]


# ---------------- pure-JAX reference (PyTorch semantics) ----------------
def conv1d_ref(x_ncl, w, b):
    # x_ncl: (B, Cin, L), w: (Cout, Cin, K), b: (Cout,)
    K = w.shape[2]
    Lout = x_ncl.shape[2] - K + 1
    out = jnp.zeros((x_ncl.shape[0], w.shape[0], Lout), jnp.float32)
    for k in range(K):
        out = out + jnp.einsum('bcl,oc->bol', x_ncl[:, :, k:k + Lout], w[:, :, k])
    return out + b[None, :, None]


def softplus_ref(x):
    return jnp.where(x > 20.0, x, jnp.log1p(jnp.exp(jnp.minimum(x, 20.0))))


def encoder_ref(x, params):
    (w1, b1, w2, b2, w3, b3, w4, b4, wout, bout, wmu, bmu, wsig, bsig) = params
    relu = lambda a: jnp.maximum(a, 0.0)
    h = jnp.transpose(x, (0, 2, 1))                  # NCL
    h = relu(conv1d_ref(h, w1, b1))
    h = relu(conv1d_ref(h, w2, b2))
    h = relu(conv1d_ref(h, w3, b3))
    h = relu(conv1d_ref(h, w4, b4))
    h = h.reshape(x.shape[0], -1)                    # channel-major flatten
    h = relu(h @ wout.T + bout)
    mu = h @ wmu.T + bmu
    sigma = softplus_ref(h @ wsig.T + bsig)
    return mu, sigma


# ---------------- deterministic parameter init ----------------
def init_params(key):
    def uniform(key, shape, fan_in):
        bound = 1.0 / np.sqrt(fan_in)
        return jax.random.uniform(key, shape, jnp.float32, -bound, bound)

    ks = jax.random.split(key, 14)
    w1 = uniform(ks[0], (C1, TOKEN_CNT, K1), TOKEN_CNT * K1)
    b1 = uniform(ks[1], (C1,), TOKEN_CNT * K1)
    w2 = uniform(ks[2], (C2, C1, K2), C1 * K2)
    b2 = uniform(ks[3], (C2,), C1 * K2)
    w3 = uniform(ks[4], (C3, C2, K3), C2 * K3)
    b3 = uniform(ks[5], (C3,), C2 * K3)
    w4 = uniform(ks[6], (C4, C3, K4), C3 * K4)
    b4 = uniform(ks[7], (C4,), C3 * K4)
    wout = uniform(ks[8], (HIDDEN, FLAT), FLAT)
    bout = uniform(ks[9], (HIDDEN,), FLAT)
    wmu = uniform(ks[10], (Z, HIDDEN), HIDDEN)
    bmu = uniform(ks[11], (Z,), HIDDEN)
    wsig = uniform(ks[12], (Z, HIDDEN), HIDDEN)
    bsig = uniform(ks[13], (Z,), HIDDEN)
    return (w1, b1, w2, b2, w3, b3, w4, b4, wout, bout, wmu, bmu, wsig, bsig)


if __name__ == "__main__":
    key = jax.random.PRNGKey(0)
    k_x, k_p = jax.random.split(key)

    # one-hot input: [batch, seq_len, token_cnt]
    tokens = jax.random.randint(k_x, (B, SEQ_LEN), 0, TOKEN_CNT)
    x = jax.nn.one_hot(tokens, TOKEN_CNT, dtype=jnp.float32)

    params = init_params(k_p)

    mu, sigma = encoder_forward(x, params)
    jax.block_until_ready((mu, sigma))

    mu_ref, sigma_ref = encoder_ref(x, params)
    np.testing.assert_allclose(np.asarray(mu), np.asarray(mu_ref), rtol=1e-4, atol=1e-5)
    np.testing.assert_allclose(np.asarray(sigma), np.asarray(sigma_ref), rtol=1e-4, atol=1e-5)

    print("KERNEL_OK")
</pallas_src>

<mosaic_0001>
module attributes {stable_mosaic.version = 11 : i64} {
  func.func @encoder_kernel(%arg0: memref<30x4xf32, #tpu.memory_space<vmem>>, %arg1: memref<8x16xf32, #tpu.memory_space<vmem>>, %arg2: memref<48x8xf32, #tpu.memory_space<vmem>>, %arg3: memref<32x8xf32, #tpu.memory_space<vmem>>, %arg4: memref<40x4xf32, #tpu.memory_space<vmem>>, %arg5: memref<20x32xf32, #tpu.memory_space<vmem>>, %arg6: memref<32x16xf32, #tpu.memory_space<vmem>>, %arg7: memref<1x84xf32, #tpu.memory_space<vmem>>, %arg8: memref<2x16xf32, #tpu.memory_space<vmem>>) attributes {dimension_semantics = [], scalar_prefetch = 0 : i64, scratch_operands = 0 : i64, tpu.core_type = #tpu.core_type<tc>} {
    %c0 = arith.constant 0 : index
    %c0_0 = arith.constant 0 : index
    %0 = vector.load %arg7[%c0, %c0_0] : memref<1x84xf32, #tpu.memory_space<vmem>>, vector<1x84xf32>
    %c0_1 = arith.constant 0 : index
    %c0_2 = arith.constant 0 : index
    %1 = vector.load %arg0[%c0_1, %c0_2] : memref<30x4xf32, #tpu.memory_space<vmem>>, vector<30x4xf32>
    %2 = vector.extract_strided_slice %1 {offsets = [0, 0], sizes = [14, 4], strides = [1, 1]} : vector<30x4xf32> to vector<14x4xf32>
    %3 = vector.extract_strided_slice %1 {offsets = [1, 0], sizes = [14, 4], strides = [1, 1]} : vector<30x4xf32> to vector<14x4xf32>
    %4 = tpu.concatenate %2, %3 in 1 : vector<14x4xf32>, vector<14x4xf32> -> vector<14x8xf32>
    %5 = vector.extract_strided_slice %1 {offsets = [15, 0], sizes = [14, 4], strides = [1, 1]} : vector<30x4xf32> to vector<14x4xf32>
    %6 = vector.extract_strided_slice %1 {offsets = [16, 0], sizes = [14, 4], strides = [1, 1]} : vector<30x4xf32> to vector<14x4xf32>
    %7 = tpu.concatenate %5, %6 in 1 : vector<14x4xf32>, vector<14x4xf32> -> vector<14x8xf32>
    %8 = tpu.concatenate %4, %7 in 0 : vector<14x8xf32>, vector<14x8xf32> -> vector<28x8xf32>
    %c0_3 = arith.constant 0 : index
    %c0_4 = arith.constant 0 : index
    %9 = vector.load %arg1[%c0_3, %c0_4] : memref<8x16xf32, #tpu.memory_space<vmem>>, vector<8x16xf32>
    %cst = arith.constant dense<0.000000e+00> : vector<28x16xf32>
    %10 = tpu.matmul %8, %9, %cst {dimension_numbers = #tpu.dot_dimension_numbers<[1], [0], [0], [1], [0, 0, 1, 1], [], []>} : vector<28x8xf32>, vector<8x16xf32>, vector<28x16xf32> -> vector<28x16xf32>
    %11 = vector.extract_strided_slice %0 {offsets = [0, 0], sizes = [1, 16], strides = [1, 1]} : vector<1x84xf32> to vector<1x16xf32>
    %12 = vector.broadcast %11 : vector<1x16xf32> to vector<28x16xf32>
    %13 = arith.addf %10, %12 : vector<28x16xf32>
    %cst_5 = arith.constant 0.000000e+00 : f32
    %14 = vector.broadcast %cst_5 : f32 to vector<28x16xf32>
    %15 = arith.maximumf %13, %14 : vector<28x16xf32>
    %16 = vector.extract_strided_slice %15 {offsets = [0, 0], sizes = [12, 16], strides = [1, 1]} : vector<28x16xf32> to vector<12x16xf32>
    %17 = vector.extract_strided_slice %15 {offsets = [1, 0], sizes = [12, 16], strides = [1, 1]} : vector<28x16xf32> to vector<12x16xf32>
    %18 = vector.extract_strided_slice %15 {offsets = [2, 0], sizes = [12, 16], strides = [1, 1]} : vector<28x16xf32> to vector<12x16xf32>
    %19 = tpu.concatenate %16, %17, %18 in 1 : vector<12x16xf32>, vector<12x16xf32>, vector<12x16xf32> -> vector<12x48xf32>
    %20 = vector.extract_strided_slice %15 {offsets = [14, 0], sizes = [12, 16], strides = [1, 1]} : vector<28x16xf32> to vector<12x16xf32>
    %21 = vector.extract_strided_slice %15 {offsets = [15, 0], sizes = [12, 16], strides = [1, 1]} : vector<28x16xf32> to vector<12x16xf32>
    %22 = vector.extract_strided_slice %15 {offsets = [16, 0], sizes = [12, 16], strides = [1, 1]} : vector<28x16xf32> to vector<12x16xf32>
    %23 = tpu.concatenate %20, %21, %22 in 1 : vector<12x16xf32>, vector<12x16xf32>, vector<12x16xf32> -> vector<12x48xf32>
    %24 = tpu.concatenate %19, %23 in 0 : vector<12x48xf32>, vector<12x48xf32> -> vector<24x48xf32>
    %c0_6 = arith.constant 0 : index
    %c0_7 = arith.constant 0 : index
    %25 = vector.load %arg2[%c0_6, %c0_7] : memref<48x8xf32, #tpu.memory_space<vmem>>, vector<48x8xf32>
    %cst_8 = arith.constant dense<0.000000e+00> : vector<24x8xf32>
    %26 = tpu.matmul %24, %25, %cst_8 {dimension_numbers = #tpu.dot_dimension_numbers<[1], [0], [0], [1], [0, 0, 1, 1], [], []>} : vector<24x48xf32>, vector<48x8xf32>, vector<24x8xf32> -> vector<24x8xf32>
    %27 = vector.extract_strided_slice %0 {offsets = [0, 16], sizes = [1, 8], strides = [1, 1]} : vector<1x84xf32> to vector<1x8xf32>
    %28 = vector.broadcast %27 : vector<1x8xf32> to vector<24x8xf32>
    %29 = arith.addf %26, %28 : vector<24x8xf32>
    %cst_9 = arith.constant 0.000000e+00 : f32
    %30 = vector.broadcast %cst_9 : f32 to vector<24x8xf32>
    %31 = arith.maximumf %29, %30 : vector<24x8xf32>
    %32 = vector.extract_strided_slice %31 {offsets = [0, 0], sizes = [9, 8], strides = [1, 1]} : vector<24x8xf32> to vector<9x8xf32>
    %33 = vector.extract_strided_slice %31 {offsets = [1, 0], sizes = [9, 8], strides = [1, 1]} : vector<24x8xf32> to vector<9x8xf32>
    %34 = vector.extract_strided_slice %31 {offsets = [2, 0], sizes = [9, 8], strides = [1, 1]} : vector<24x8xf32> to vector<9x8xf32>
    %35 = vector.extract_strided_slice %31 {offsets = [3, 0], sizes = [9, 8], strides = [1, 1]} : vector<24x8xf32> to vector<9x8xf32>
    %36 = tpu.concatenate %32, %33, %34, %35 in 1 : vector<9x8xf32>, vector<9x8xf32>, vector<9x8xf32>, vector<9x8xf32> -> vector<9x32xf32>
    %37 = vector.extract_strided_slice %31 {offsets = [12, 0], sizes = [9, 8], strides = [1, 1]} : vector<24x8xf32> to vector<9x8xf32>
    %38 = vector.extract_strided_slice %31 {offsets = [13, 0], sizes = [9, 8], strides = [1, 1]} : vector<24x8xf32> to vector<9x8xf32>
    %39 = vector.extract_strided_slice %31 {offsets = [14, 0], sizes = [9, 8], strides = [1, 1]} : vector<24x8xf32> to vector<9x8xf32>
    %40 = vector.extract_strided_slice %31 {offsets = [15, 0], sizes = [9, 8], strides = [1, 1]} : vector<24x8xf32> to vector<9x8xf32>
    %41 = tpu.concatenate %37, %38, %39, %40 in 1 : vector<9x8xf32>, vector<9x8xf32>, vector<9x8xf32>, vector<9x8xf32> -> vector<9x32xf32>
    %42 = tpu.concatenate %36, %41 in 0 : vector<9x32xf32>, vector<9x32xf32> -> vector<18x32xf32>
    %c0_10 = arith.constant 0 : index
    %c0_11 = arith.constant 0 : index
    %43 = vector.load %arg3[%c0_10, %c0_11] : memref<32x8xf32, #tpu.memory_space<vmem>>, vector<32x8xf32>
    %cst_12 = arith.constant dense<0.000000e+00> : vector<18x8xf32>
    %44 = tpu.matmul %42, %43, %cst_12 {dimension_numbers = #tpu.dot_dimension_numbers<[1], [0], [0], [1], [0, 0, 1, 1], [], []>} : vector<18x32xf32>, vector<32x8xf32>, vector<18x8xf32> -> vector<18x8xf32>
    %45 = vector.extract_strided_slice %0 {offsets = [0, 24], sizes = [1, 8], strides = [1, 1]} : vector<1x84xf32> to vector<1x8xf32>
    %46 = vector.broadcast %45 : vector<1x8xf32> to vector<18x8xf32>
    %47 = arith.addf %44, %46 : vector<18x8xf32>
    %cst_13 = arith.constant 0.000000e+00 : f32
    %48 = vector.broadcast %cst_13 : f32 to vector<18x8xf32>
    %49 = arith.maximumf %47, %48 : vector<18x8xf32>
    %50 = vector.extract_strided_slice %49 {offsets = [0, 0], sizes = [5, 8], strides = [1, 1]} : vector<18x8xf32> to vector<5x8xf32>
    %51 = vector.extract_strided_slice %49 {offsets = [1, 0], sizes = [5, 8], strides = [1, 1]} : vector<18x8xf32> to vector<5x8xf32>
    %52 = vector.extract_strided_slice %49 {offsets = [2, 0], sizes = [5, 8], strides = [1, 1]} : vector<18x8xf32> to vector<5x8xf32>
    %53 = vector.extract_strided_slice %49 {offsets = [3, 0], sizes = [5, 8], strides = [1, 1]} : vector<18x8xf32> to vector<5x8xf32>
    %54 = vector.extract_strided_slice %49 {offsets = [4, 0], sizes = [5, 8], strides = [1, 1]} : vector<18x8xf32> to vector<5x8xf32>
    %55 = tpu.concatenate %50, %51, %52, %53, %54 in 1 : vector<5x8xf32>, vector<5x8xf32>, vector<5x8xf32>, vector<5x8xf32>, vector<5x8xf32> -> vector<5x40xf32>
    %56 = vector.extract_strided_slice %49 {offsets = [9, 0], sizes = [5, 8], strides = [1, 1]} : vector<18x8xf32> to vector<5x8xf32>
    %57 = vector.extract_strided_slice %49 {offsets = [10, 0], sizes = [5, 8], strides = [1, 1]} : vector<18x8xf32> to vector<5x8xf32>
    %58 = vector.extract_strided_slice %49 {offsets = [11, 0], sizes = [5, 8], strides = [1, 1]} : vector<18x8xf32> to vector<5x8xf32>
    %59 = vector.extract_strided_slice %49 {offsets = [12, 0], sizes = [5, 8], strides = [1, 1]} : vector<18x8xf32> to vector<5x8xf32>
    %60 = vector.extract_strided_slice %49 {offsets = [13, 0], sizes = [5, 8], strides = [1, 1]} : vector<18x8xf32> to vector<5x8xf32>
    %61 = tpu.concatenate %56, %57, %58, %59, %60 in 1 : vector<5x8xf32>, vector<5x8xf32>, vector<5x8xf32>, vector<5x8xf32>, vector<5x8xf32> -> vector<5x40xf32>
    %62 = tpu.concatenate %55, %61 in 0 : vector<5x40xf32>, vector<5x40xf32> -> vector<10x40xf32>
    %c0_14 = arith.constant 0 : index
    %c0_15 = arith.constant 0 : index
    %63 = vector.load %arg4[%c0_14, %c0_15] : memref<40x4xf32, #tpu.memory_space<vmem>>, vector<40x4xf32>
    %cst_16 = arith.constant dense<0.000000e+00> : vector<10x4xf32>
    %64 = tpu.matmul %62, %63, %cst_16 {dimension_numbers = #tpu.dot_dimension_numbers<[1], [0], [0], [1], [0, 0, 1, 1], [], []>} : vector<10x40xf32>, vector<40x4xf32>, vector<10x4xf32> -> vector<10x4xf32>
    %65 = vector.extract_strided_slice %0 {offsets = [0, 32], sizes = [1, 4], strides = [1, 1]} : vector<1x84xf32> to vector<1x4xf32>
    %66 = vector.broadcast %65 : vector<1x4xf32> to vector<10x4xf32>
    %67 = arith.addf %64, %66 : vector<10x4xf32>
    %cst_17 = arith.constant 0.000000e+00 : f32
    %68 = vector.broadcast %cst_17 : f32 to vector<10x4xf32>
    %69 = arith.maximumf %67, %68 : vector<10x4xf32>
    %70 = vector.extract_strided_slice %69 {offsets = [0, 0], sizes = [1, 4], strides = [1, 1]} : vector<10x4xf32> to vector<1x4xf32>
    %71 = vector.extract_strided_slice %69 {offsets = [1, 0], sizes = [1, 4], strides = [1, 1]} : vector<10x4xf32> to vector<1x4xf32>
    %72 = vector.extract_strided_slice %69 {offsets = [2, 0], sizes = [1, 4], strides = [1, 1]} : vector<10x4xf32> to vector<1x4xf32>
    %73 = vector.extract_strided_slice %69 {offsets = [3, 0], sizes = [1, 4], strides = [1, 1]} : vector<10x4xf32> to vector<1x4xf32>
    %74 = vector.extract_strided_slice %69 {offsets = [4, 0], sizes = [1, 4], strides = [1, 1]} : vector<10x4xf32> to vector<1x4xf32>
    %75 = tpu.concatenate %70, %71, %72, %73, %74 in 1 : vector<1x4xf32>, vector<1x4xf32>, vector<1x4xf32>, vector<1x4xf32>, vector<1x4xf32> -> vector<1x20xf32>
    %76 = vector.extract_strided_slice %69 {offsets = [5, 0], sizes = [1, 4], strides = [1, 1]} : vector<10x4xf32> to vector<1x4xf32>
    %77 = vector.extract_strided_slice %69 {offsets = [6, 0], sizes = [1, 4], strides = [1, 1]} : vector<10x4xf32> to vector<1x4xf32>
    %78 = vector.extract_strided_slice %69 {offsets = [7, 0], sizes = [1, 4], strides = [1, 1]} : vector<10x4xf32> to vector<1x4xf32>
    %79 = vector.extract_strided_slice %69 {offsets = [8, 0], sizes = [1, 4], strides = [1, 1]} : vector<10x4xf32> to vector<1x4xf32>
    %80 = vector.extract_strided_slice %69 {offsets = [9, 0], sizes = [1, 4], strides = [1, 1]} : vector<10x4xf32> to vector<1x4xf32>
    %81 = tpu.concatenate %76, %77, %78, %79, %80 in 1 : vector<1x4xf32>, vector<1x4xf32>, vector<1x4xf32>, vector<1x4xf32>, vector<1x4xf32> -> vector<1x20xf32>
    %82 = tpu.concatenate %75, %81 in 0 : vector<1x20xf32>, vector<1x20xf32> -> vector<2x20xf32>
    %c0_18 = arith.constant 0 : index
    %c0_19 = arith.constant 0 : index
    %83 = vector.load %arg5[%c0_18, %c0_19] : memref<20x32xf32, #tpu.memory_space<vmem>>, vector<20x32xf32>
    %cst_20 = arith.constant dense<0.000000e+00> : vector<2x32xf32>
    %84 = tpu.matmul %82, %83, %cst_20 {dimension_numbers = #tpu.dot_dimension_numbers<[1], [0], [0], [1], [0, 0, 1, 1], [], []>} : vector<2x20xf32>, vector<20x32xf32>, vector<2x32xf32> -> vector<2x32xf32>
    %85 = vector.extract_strided_slice %0 {offsets = [0, 36], sizes = [1, 32], strides = [1, 1]} : vector<1x84xf32> to vector<1x32xf32>
    %86 = vector.broadcast %85 : vector<1x32xf32> to vector<2x32xf32>
    %87 = arith.addf %84, %86 : vector<2x32xf32>
    %cst_21 = arith.constant 0.000000e+00 : f32
    %88 = vector.broadcast %cst_21 : f32 to vector<2x32xf32>
    %89 = arith.maximumf %87, %88 : vector<2x32xf32>
    %c0_22 = arith.constant 0 : index
    %c0_23 = arith.constant 0 : index
    %90 = vector.load %arg6[%c0_22, %c0_23] : memref<32x16xf32, #tpu.memory_space<vmem>>, vector<32x16xf32>
    %cst_24 = arith.constant dense<0.000000e+00> : vector<2x16xf32>
    %91 = tpu.matmul %89, %90, %cst_24 {dimension_numbers = #tpu.dot_dimension_numbers<[1], [0], [0], [1], [0, 0, 1, 1], [], []>} : vector<2x32xf32>, vector<32x16xf32>, vector<2x16xf32> -> vector<2x16xf32>
    %92 = vector.extract_strided_slice %0 {offsets = [0, 68], sizes = [1, 16], strides = [1, 1]} : vector<1x84xf32> to vector<1x16xf32>
    %93 = vector.broadcast %92 : vector<1x16xf32> to vector<2x16xf32>
    %94 = arith.addf %91, %93 : vector<2x16xf32>
    %cst_25 = arith.constant 2.000000e+01 : f32
    %95 = vector.broadcast %cst_25 : f32 to vector<2x16xf32>
    %96 = arith.cmpf ogt, %94, %95 : vector<2x16xf32>
    %cst_26 = arith.constant 2.000000e+01 : f32
    %97 = vector.broadcast %cst_26 : f32 to vector<2x16xf32>
    %98 = arith.minimumf %94, %97 : vector<2x16xf32>
    %99 = math.exp %98 : vector<2x16xf32>
    %100 = math.log1p %99 : vector<2x16xf32>
    %101 = arith.select %96, %94, %100 : vector<2x16xi1>, vector<2x16xf32>
    %102 = tpu.iota {dimensions = array<i32: 1>} : vector<2x16xi32>
    %c8_i32 = arith.constant 8 : i32
    %103 = vector.broadcast %c8_i32 : i32 to vector<2x16xi32>
    %104 = arith.cmpi slt, %102, %103 : vector<2x16xi32>
    %105 = arith.select %104, %94, %101 : vector<2x16xi1>, vector<2x16xf32>
    %c0_27 = arith.constant 0 : index
    %c0_28 = arith.constant 0 : index
    %106 = vector.load %arg8[%c0_27, %c0_28] : memref<2x16xf32, #tpu.memory_space<vmem>>, vector<2x16xf32>
    tpu.vector_store %arg8[%c0_27, %c0_28], %105 {strides = array<i32>} : memref<2x16xf32, #tpu.memory_space<vmem>>, vector<2x16xf32>,
    return
  }
}

</mosaic_0001>

<bundles_post_ra>
// kernel: encoder_forward.1
= control target key start
LH: loop header
LB: loop body
LE: loop exit
PB: predicated region body
PF: predicated region fallthrough
CT: control target
= control target key end

     0   :  { %vm36_vm0 = vcmask 1046528   ;;  %s1046_s15 = smov 4   ;;  %vm46_vm1 = vcmask 31744   ;;  %vm84_vm2 = vcmask 64512   ;;  %vm75_vm3 = vcmask 1045504   ;;  %s1051_s28 = smov 112   ;;  %s1351_s0 = inlined_call_operand.vmem [shape: f32[30,4], index: 0, kind: input, shape index: {}]   ;;  %s1352_s1 = inlined_call_operand.vmem [shape: f32[8,16], index: 1, kind: input, shape index: {}]   ;;  %s1353_s2 = inlined_call_operand.vmem [shape: f32[48,8], index: 2, kind: input, shape index: {}]   ;;  %s1354_s7 = inlined_call_operand.vmem [shape: f32[1,84], index: 7, kind: input, shape index: {}]   ;;  %s1355_s3 = inlined_call_operand.vmem [shape: f32[32,8], index: 3, kind: input, shape index: {}]   ;;  %s1356_s4 = inlined_call_operand.vmem [shape: f32[40,4], index: 4, kind: input, shape index: {}]   ;;  %s1357_s5 = inlined_call_operand.vmem [shape: f32[20,32], index: 5, kind: input, shape index: {}]   ;;  %s1358_s6 = inlined_call_operand.vmem [shape: f32[32,16], index: 6, kind: input, shape index: {}]   ;;  %s1359_s8 = inlined_call_operand.vmem [shape: f32[2,16], index: 8, kind: output, shape index: {}]  }
   0x1   :  { %v32_v0 = vld [vmem:[%s1351_s0 + $0x10] sm:$0xff]  ;;  %v30_v1 = vld [vmem:[%s1351_s0] sm:$0xff]  ;;  %v31_v2 = vld [vmem:[%s1351_s0 + $0x8] sm:$0xff]  ;;  %v1047_v27 = vmov 0.0   ;;  %vm1048_vm4 = vmmov 0   ;;  %vm204_vm5 = vcmask 130048  }
   0x2   :  { %v51_v3 = vrot.slane %v32_v0, 1  ;;  %v37_v4 = vrot.slane %v30_v1, 1  ;;  %v38_v5 = vrot.slane %v31_v2, 1  ;;  %v33_v6 = vld [vmem:[%s1351_s0 + $0x18] sm:$0x3f]  ;;  %v77_v7 = vld [vmem:[%s1352_s1] sm:$0xff]  ;;  %979 = vmatprep.subr.mxu0 %v1047_v27  ;;  %987 = vmatprep.mubr.msk.f32.mxu0 %vm1048_vm4, %v1047_v27 }
   0x3   :  { %v52_v8 = vrot.slane %v33_v6, 1  ;;  %950 = vmatprep.subr.mxu1 %v77_v7  ;;  %v259_v28 = vld [vmem:[%s1353_s2 + $0x28] sm:$0xff]  ;;  %v258_v29 = vld [vmem:[%s1353_s2 + $0x20] sm:$0xff]  ;;  %v257_v30 = vld [vmem:[%s1353_s2 + $0x18] sm:$0xff]  ;;  %vm207_vm6 = vcmask 261120   ;;  %vm263_vm7 = vcmask 392192  }
   0x4   :  { %54 = vrot.lane.b32.xlu0 %v51_v3, %s1046_s15  ;;  %v39_v9 = vsel %vm36_vm0, %v37_v4, %v38_v5  ;;  %951 = vmatpush3.msra.mxu1 %v77_v7  ;;  %v256_v31 = vld [vmem:[%s1353_s2 + $0x10] sm:$0xff]  ;;  %v255_v32 = vld [vmem:[%s1353_s2 + $0x8] sm:$0xff]  ;;  %v1163_v33 = vld [vmem:[%s1354_s7] ss:$0 sm:$0xff]  ;;  %s1050_s7 = smov 16   ;;  %vm252_vm8 = vcmask 1043456  }
   0x5   :  { %40 = vrot.lane.b32.xlu1 %v39_v9, %s1046_s15  ;;  %v53_v10 = vsel %vm36_vm0, %v51_v3, %v52_v8  ;;  %958 = vmatprep.subr.mxu1 %v1047_v27  ;;  %v254_v34 = vld [vmem:[%s1353_s2] sm:$0xff]  ;;  %s1049_s2 = smov 32   ;;  %s1052_s0 = smov 8   ;;  %vm375_vm9 = vcmask 1044480   ;;  %vm389_vm10 = vcmask 195584   ;;  %vm429_vm11 = vcmask 1040384  }
   0x6   :  { %s1054_s1 = smov 104   ;;  %s1055_s26 = smov 96   ;;  %vm589_vm12 = vcmask 326656   ;;  %vm691_vm13 = vcmask 97280   ;;  %vm715_vm14 = vcmask 162816  }
   0x7   :  { %s1056_s11 = smov 12  }
   0x8   :  { %56 = vrot.lane.b32.xlu0 %v53_v10, %s1046_s15 }
   0x9   :  { %42 = vrot.lane.b32.xlu1 %v38_v5, %s1046_s15 }
   0xc   :  { %58 = vrot.lane.b32.xlu0 %v52_v8, %s1046_s15 }
  0x76   :  { %v55_v11 = vpop.permute.xlu0 %54 }
  0x77   :  { %v41_v12 = vpop.permute.xlu1 %40  ;;  %v63_v14 = vsel %vm46_vm1, %v31_v2, %v55_v11 }
  0x78   :  { %v47_v13 = vsel %vm46_vm1, %v30_v1, %v41_v12  ;;  %v69_v18 = vrot.slane %v63_v14, 1 }
  0x79   :  { %952 = vmatprep.mubr.msk.f32.mxu1 %vm84_vm2, %v47_v13 }
  0x7a   :  { %v57_v15 = vpop.permute.xlu0 %56 }
  0x7b   :  { %v64_v16 = vsel %vm46_vm1, %v32_v0, %v57_v15  ;;  %v43_v17 = vpop.permute.xlu1 %42 }
  0x7c   :  { %v70_v19 = vrot.slane %v64_v16, 1  ;;  %v48_v20 = vsel %vm46_vm1, %v31_v2, %v43_v17 }
  0x7e   :  { %v59_v21 = vpop.permute.xlu0 %58  ;;  %v71_v22 = vsel %vm36_vm0, %v69_v18, %v70_v19 }
  0x7f   :  { %v65_v23 = vsel %vm46_vm1, %v33_v6, %v59_v21  ;;  %v76_v24 = vsel %vm75_vm3, %v48_v20, %v71_v22  ;;  %v434_v22 = vld [vmem:[%s1355_s3 + $0x18] sm:$0xff] }
  0x80   :  { %v72_v25 = vrot.slane %v65_v23, 1  ;;  %953 = vmatmul.mubr.msk.f32.vlgmr.msra.gmra.mxu1 %vm84_vm2, %v76_v24  ;;  %980 = vmatpush3.msra.mxu0 %v434_v22 }
  0x81   :  { %959 = vmatpush3.msra.mxu1 %v259_v28  ;;  %981 = vmatprep.subr.mxu0 %v1047_v27  ;;  %v432_v28 = vld [vmem:[%s1355_s3 + $0x8] sm:$0xff] }
  0x82   :  { %v73_v26 = vsel %vm36_vm0, %v70_v19, %v72_v25  ;;  %960 = vmatprep.subr.mxu1 %v1047_v27 }
  0x83   :  { %955 = vmatprep.mubr.msk.f32.mxu1 %vm84_vm2, %v73_v26  ;;  %961 = vmatpush3.msra.mxu1 %v258_v29  ;;  %v433_v26 = vld [vmem:[%s1355_s3 + $0x10] sm:$0xff] }
  0x84   :  { %956 = vmatmul.mubr.msk.f32.gmra.mxu1 %vm84_vm2, %v72_v25  ;;  %962 = vmatprep.subr.mxu1 %v1047_v27 }
  0x85   :  { %963 = vmatpush3.msra.mxu1 %v257_v30  ;;  %970 = vmatprep.mubr.msk.f32.mxu1 %vm1048_vm4, %v1047_v27  ;;  %v431_v30 = vld [vmem:[%s1355_s3] sm:$0xff]  ;;  %s1053_s3 = smov 24  }
  0x86   :  { %964 = vmatprep.subr.mxu1 %v1047_v27  ;;  %982 = vmatpush3.msra.mxu0 %v433_v26 }
  0x87   :  { %965 = vmatpush3.msra.mxu1 %v256_v31  ;;  %983 = vmatprep.subr.mxu0 %v1047_v27 }
  0x88   :  { %966 = vmatprep.subr.mxu1 %v1047_v27  ;;  %984 = vmatpush3.msra.mxu0 %v432_v28  ;;  %v585_v28 = vld [vmem:[%s1356_s4 + $0x20] sm:$0xff] }
  0x89   :  { %967 = vmatpush3.msra.mxu1 %v255_v32  ;;  %985 = vmatprep.subr.mxu0 %v1047_v27 }
  0x8a   :  { %968 = vmatprep.subr.mxu1 %v1047_v27  ;;  %986 = vmatpush3.msra.mxu0 %v431_v30  ;;  %v583_v30 = vld [vmem:[%s1356_s4 + $0x10] sm:$0xff] }
  0x8b   :  { %969 = vmatpush3.msra.mxu1 %v254_v34  ;;  %996 = vmatprep.subr.mxu0 %v585_v28 }
  0x8c   :  { %1009 = vmatprep.subr.mxu1 %v1047_v27 }
 0x140   :  { %v954_v35 = vpop.f32.mrf.mxu1 }
 0x141   :  { %v167_v36 = vadd.f32 %v954_v35, %v1163_v33 }
 0x142   :  { %v161_v37 = vpop.f32.mrf.mxu1 }
 0x143   :  { %v181_v38 = vmax.f32 %v167_v36, 0.0  ;;  %v162_v39 = vadd.f32 %v1163_v33, %v161_v37 }
 0x144   :  { %v957_v40 = vpop.f32.mrf.mxu1 }
 0x145   :  { %v180_v41 = vmax.f32 %v162_v39, 0.0  ;;  %v177_v42 = vadd.f32 %v957_v40, %v1163_v33  ;;  %v196_v47 = vrot.slane %v181_v38, 2  ;;  %v187_v48 = vrot.slane %v181_v38, 1 }
 0x146   :  { %v171_v43 = vpop.f32.mrf.mxu1 }
 0x147   :  { %v186_v44 = vrot.slane %v180_v41, 1  ;;  %v195_v45 = vrot.slane %v180_v41, 2  ;;  %v172_v46 = vadd.f32 %v1163_v33, %v171_v43  ;;  %v183_v52 = vmax.f32 %v177_v42, 0.0 }
 0x149   :  { %v182_v49 = vmax.f32 %v172_v46, 0.0  ;;  %v197_v50 = vsel %vm75_vm3, %v195_v45, %v196_v47  ;;  %v188_v51 = vsel %vm36_vm0, %v186_v44, %v187_v48  ;;  %v226_v56 = vrot.slane %v183_v52, 2 }
 0x14a   :  { %198 = vrot.lane.b32.xlu0 %v197_v50, %s1049_s2  ;;  %189 = vrot.lane.b32.xlu1 %v188_v51, %s1050_s7  ;;  %v214_v57 = vrot.slane %v183_v52, 1 }
 0x14b   :  { %v212_v53 = vrot.slane %v182_v49, 1  ;;  %v225_v54 = vrot.slane %v182_v49, 2 }
 0x14d   :  { %v213_v55 = vsel %vm36_vm0, %v187_v48, %v212_v53  ;;  %v227_v58 = vsel %vm75_vm3, %v225_v54, %v226_v56  ;;  %v215_v59 = vsel %vm36_vm0, %v212_v53, %v214_v57 }
 0x14e   :  { %216 = vrot.lane.b32.xlu0 %v213_v55, %s1050_s7  ;;  %228 = vrot.lane.b32.xlu1 %v225_v54, %s1049_s2 }
 0x152   :  { %230 = vrot.lane.b32.xlu0 %v227_v58, %s1049_s2  ;;  %218 = vrot.lane.b32.xlu1 %v215_v59, %s1050_s7 }
 0x156   :  { %200 = vrot.lane.b32.xlu0 %v196_v47, %s1049_s2  ;;  %191 = vrot.lane.b32.xlu1 %v187_v48, %s1050_s7 }
 0x15a   :  { %232 = vrot.lane.b32.xlu0 %v226_v56, %s1049_s2  ;;  %220 = vrot.lane.b32.xlu1 %v214_v57, %s1050_s7 }
 0x15e   :  { %260 = vrot.lane.b32.xlu1 %v1163_v33, %s1051_s28 }
 0x1bc   :  { %v199_v60 = vpop.permute.xlu0 %198  ;;  %v190_v61 = vpop.permute.xlu1 %189 }
 0x1bd   :  { %v205_v62 = vsel %vm204_vm5, %v180_v41, %v190_v61 }
 0x1be   :  { %v208_v63 = vsel %vm207_vm6, %v205_v62, %v199_v60 }
 0x1bf   :  { %971 = vmatmul.mubr.msk.f32.vlgmr.msra.gmra.mxu1 %vm263_vm7, %v208_v63 }
 0x1c0   :  { %v217_v0 = vpop.permute.xlu0 %216  ;;  %v229_v1 = vpop.permute.xlu1 %228  ;;  %973 = vmatprep.mubr.msk.f32.mxu1 %vm1048_vm4, %v1047_v27 }
 0x1c1   :  { %v237_v2 = vsel %vm204_vm5, %v181_v38, %v217_v0 }
 0x1c2   :  { %v240_v4 = vsel %vm207_vm6, %v237_v2, %v229_v1 }
 0x1c3   :  { %v246_v8 = vrot.slane %v240_v4, 2 }
 0x1c4   :  { %v231_v3 = vpop.permute.xlu0 %230  ;;  %v219_v5 = vpop.permute.xlu1 %218 }
 0x1c5   :  { %v238_v6 = vsel %vm204_vm5, %v182_v49, %v219_v5 }
 0x1c6   :  { %v241_v7 = vsel %vm207_vm6, %v238_v6, %v231_v3 }
 0x1c7   :  { %v247_v9 = vrot.slane %v241_v7, 2 }
 0x1c8   :  { %v201_v10 = vpop.permute.xlu0 %200  ;;  %v192_v11 = vpop.permute.xlu1 %191 }
 0x1c9   :  { %v206_v12 = vsel %vm204_vm5, %v181_v38, %v192_v11  ;;  %v248_v13 = vsel %vm75_vm3, %v246_v8, %v247_v9 }
 0x1ca   :  { %v209_v14 = vsel %vm207_vm6, %v206_v12, %v201_v10 }
 0x1cb   :  { %v253_v16 = vsel %vm252_vm8, %v209_v14, %v248_v13 }
 0x1cc   :  { %v233_v15 = vpop.permute.xlu0 %232  ;;  %974 = vmatmul.mubr.msk.f32.gmra.mxu1 %vm263_vm7, %v253_v16  ;;  %v221_v17 = vpop.permute.xlu1 %220 }
 0x1cd   :  { %v239_v18 = vsel %vm204_vm5, %v183_v52, %v221_v17  ;;  %976 = vmatprep.mubr.msk.f32.mxu1 %vm1048_vm4, %v1047_v27 }
 0x1ce   :  { %v242_v19 = vsel %vm207_vm6, %v239_v18, %v233_v15 }
 0x1cf   :  { %v249_v20 = vrot.slane %v242_v19, 2 }
 0x1d0   :  { %v261_v25 = vpop.permute.xlu1 %260 }
 0x1d1   :  { %v250_v21 = vsel %vm75_vm3, %v247_v9, %v249_v20 }
 0x1d2   :  { %977 = vmatmul.mubr.msk.f32.gmra.mxu1 %vm263_vm7, %v250_v21 }
 0x1d3   :  { %1015 = vmatprep.mubr.msk.f32.mxu1 %vm1048_vm4, %v1047_v27 }
 0x27f   :  { %v338_v23 = vpop.f32.mrf.mxu1 }
 0x280   :  { %v339_v29 = vadd.f32 %v338_v23, %v261_v25 }
 0x281   :  { %v972_v24 = vpop.f32.mrf.mxu1 }
 0x282   :  { %v352_v32 = vmax.f32 %v339_v29, 0.0  ;;  %v584_v29 = vld [vmem:[%s1356_s4 + $0x18] sm:$0xff] }
 0x284   :  { %v357_v38 = vrot.slane %v352_v32, 1  ;;  %v366_v45 = vrot.slane %v352_v32, 2  ;;  %v376_v47 = vrot.slane %v352_v32, 3 }
 0x28c   :  { %v343_v31 = vpop.f32.mrf.mxu1 }
 0x28d   :  { %v344_v34 = vadd.f32 %v343_v31, %v261_v25 }
 0x28e   :  { %v975_v35 = vpop.f32.mrf.mxu1 }
 0x28f   :  { %v353_v36 = vmax.f32 %v344_v34, 0.0 }
 0x291   :  { %v358_v37 = vrot.slane %v353_v36, 1  ;;  %v367_v40 = vrot.slane %v353_v36, 2  ;;  %v377_v43 = vrot.slane %v353_v36, 3 }
 0x292   :  { %v348_v39 = vpop.f32.mrf.mxu1 }
 0x293   :  { %v349_v41 = vadd.f32 %v348_v39, %v261_v25  ;;  %362 = vrot.lane.b32.xlu1 %v358_v37, %s1052_s0  ;;  %v359_v42 = vsel %vm36_vm0, %v357_v38, %v358_v37  ;;  %v368_v48 = vsel %vm75_vm3, %v366_v45, %v367_v40  ;;  %v378_v49 = vsel %vm375_vm9, %v376_v47, %v377_v43 }
 0x294   :  { %v978_v44 = vpop.f32.mrf.mxu1  ;;  %360 = vrot.lane.b32.xlu0 %v359_v42, %s1052_s0 }
 0x295   :  { %v354_v46 = vmax.f32 %v349_v41, 0.0 }
 0x297   :  { %369 = vrot.lane.b32.xlu1 %v368_v48, %s1050_s7  ;;  %v401_v50 = vrot.slane %v354_v46, 2  ;;  %v393_v51 = vrot.slane %v354_v46, 1  ;;  %v409_v53 = vrot.slane %v354_v46, 3 }
 0x298   :  { %379 = vrot.lane.b32.xlu0 %v378_v49, %s1053_s3 }
 0x299   :  { %v394_v52 = vsel %vm36_vm0, %v358_v37, %v393_v51  ;;  %v410_v54 = vsel %vm375_vm9, %v377_v43, %v409_v53  ;;  %v402_v55 = vsel %vm75_vm3, %v367_v40, %v401_v50  ;;  %v582_v37 = vld [vmem:[%s1356_s4 + $0x8] sm:$0xff] }
 0x29b   :  { %405 = vrot.lane.b32.xlu1 %v401_v50, %s1050_s7 }
 0x29c   :  { %397 = vrot.lane.b32.xlu0 %v393_v51, %s1052_s0 }
 0x29f   :  { %395 = vrot.lane.b32.xlu1 %v394_v52, %s1052_s0 }
 0x2a0   :  { %413 = vrot.lane.b32.xlu0 %v409_v53, %s1053_s3 }
 0x2a3   :  { %411 = vrot.lane.b32.xlu1 %v410_v54, %s1053_s3 }
 0x2a4   :  { %403 = vrot.lane.b32.xlu0 %v402_v55, %s1050_s7 }
 0x2a7   :  { %381 = vrot.lane.b32.xlu1 %v377_v43, %s1053_s3  ;;  %v581_v43 = vld [vmem:[%s1356_s4] sm:$0xff] }
 0x2a8   :  { %371 = vrot.lane.b32.xlu0 %v367_v40, %s1050_s7 }
 0x2ac   :  { %435 = vrot.lane.b32.xlu0 %v1163_v33, %s1054_s1 }
 0x305   :  { %v363_v56 = vpop.permute.xlu1 %362 }
 0x306   :  { %v361_v57 = vpop.permute.xlu0 %360  ;;  %v386_v13 = vsel %vm84_vm2, %v353_v36, %v363_v56 }
 0x307   :  { %v385_v58 = vsel %vm84_vm2, %v352_v32, %v361_v57 }
 0x309   :  { %v370_v59 = vpop.permute.xlu1 %369 }
 0x30a   :  { %v387_v60 = vsel %vm204_vm5, %v385_v58, %v370_v59  ;;  %v380_v61 = vpop.permute.xlu0 %379 }
 0x30b   :  { %v390_v62 = vsel %vm389_vm10, %v387_v60, %v380_v61 }
 0x30c   :  { %988 = vmatmul.mubr.msk.f32.vlgmr.msra.gmra.mxu0 %vm207_vm6, %v390_v62 }
 0x30d   :  { %v406_v63 = vpop.permute.xlu1 %405  ;;  %990 = vmatprep.mubr.msk.f32.mxu0 %vm1048_vm4, %v1047_v27  ;;  %997 = vmatpush3.msra.mxu0 %v585_v28 }
 0x30e   :  { %v398_v0 = vpop.permute.xlu0 %397  ;;  %998 = vmatprep.subr.mxu0 %v584_v29 }
 0x30f   :  { %v418_v2 = vsel %vm84_vm2, %v354_v46, %v398_v0  ;;  %999 = vmatpush3.msra.mxu0 %v584_v29 }
 0x310   :  { %v420_v4 = vsel %vm204_vm5, %v418_v2, %v406_v63  ;;  %1000 = vmatprep.subr.mxu0 %v583_v30 }
 0x311   :  { %v396_v1 = vpop.permute.xlu1 %395  ;;  %1001 = vmatpush3.msra.mxu0 %v583_v30 }
 0x312   :  { %v414_v3 = vpop.permute.xlu0 %413  ;;  %v417_v6 = vsel %vm84_vm2, %v353_v36, %v396_v1  ;;  %1002 = vmatprep.subr.mxu0 %v582_v37 }
 0x313   :  { %v422_v7 = vsel %vm389_vm10, %v420_v4, %v414_v3  ;;  %1003 = vmatpush3.msra.mxu0 %v582_v37 }
 0x314   :  { %v426_v11 = vrot.slane %v422_v7, 3  ;;  %1004 = vmatprep.subr.mxu0 %v581_v43  ;;  %v711_v7 = vld [vmem:[%s1357_s5 + $0x10] sm:$0xf] }
 0x315   :  { %v412_v5 = vpop.permute.xlu1 %411  ;;  %1005 = vmatpush3.msra.mxu0 %v581_v43  ;;  %1010 = vmatpush3.msk.msra.mxu1 %vm252_vm8, %v711_v7 }
 0x316   :  { %v404_v8 = vpop.permute.xlu0 %403  ;;  %1018 = vmatprep.subr.mxu0 %v1047_v27  ;;  %1011 = vmatprep.subr.mxu1 %v1047_v27 }
 0x317   :  { %v419_v9 = vsel %vm204_vm5, %v417_v6, %v404_v8  ;;  %v710_v8 = vld [vmem:[%s1357_s5 + $0x8] sm:$0xff] }
 0x318   :  { %v421_v10 = vsel %vm389_vm10, %v419_v9, %v412_v5  ;;  %1012 = vmatpush3.msra.mxu1 %v710_v8 }
 0x319   :  { %v425_v12 = vrot.slane %v421_v10, 3  ;;  %v382_v15 = vpop.permute.xlu1 %381  ;;  %1013 = vmatprep.subr.mxu1 %v1047_v27  ;;  %v709_v10 = vld [vmem:[%s1357_s5] sm:$0xff]  ;;  %s1057_s5 = smov 92  }
 0x31a   :  { %v372_v14 = vpop.permute.xlu0 %371  ;;  %1014 = vmatpush3.msra.mxu1 %v709_v10 }
 0x31b   :  { %v388_v16 = vsel %vm204_vm5, %v386_v13, %v372_v14  ;;  %v427_v17 = vsel %vm375_vm9, %v425_v12, %v426_v11 }
 0x31c   :  { %v391_v18 = vsel %vm389_vm10, %v388_v16, %v382_v15 }
 0x31d   :  { %v430_v19 = vsel %vm429_vm11, %v391_v18, %v427_v17 }
 0x31e   :  { %991 = vmatmul.mubr.msk.f32.gmra.mxu0 %vm207_vm6, %v430_v19  ;;  %v436_v20 = vpop.permute.xlu0 %435  ;;  %v796_v19 = vld [vmem:[%s1358_s6 + $0x18] sm:$0xff] }
 0x31f   :  { %993 = vmatprep.mubr.msk.f32.mxu0 %vm1048_vm4, %v1047_v27 }
 0x322   :  { %994 = vmatmul.mubr.msk.f32.gmra.mxu0 %vm207_vm6, %v426_v11 }
 0x3cc   :  { %v512_v21 = vpop.f32.mrf.mxu0 }
 0x3cd   :  { %v513_v22 = vadd.f32 %v512_v21, %v436_v20 }
 0x3ce   :  { %v989_v23 = vpop.f32.mrf.mxu0 }
 0x3cf   :  { %v526_v24 = vmax.f32 %v513_v22, 0.0 }
 0x3d1   :  { %v530_v25 = vrot.slane %v526_v24, 1  ;;  %v534_v26 = vrot.slane %v526_v24, 2  ;;  %v538_v45 = vrot.slane %v526_v24, 3  ;;  %v543_v51 = vrot.slane %v526_v24, 4 }
 0x3d3   :  { %531 = vrot.lane.b32.xlu1 %v530_v25, %s1052_s0 }
 0x3d7   :  { %535 = vrot.lane.b32.xlu1 %v534_v26, %s1050_s7 }
 0x3de   :  { %v517_v31 = vpop.f32.mrf.mxu0 }
 0x3df   :  { %v518_v32 = vadd.f32 %v517_v31, %v436_v20 }
 0x3e0   :  { %v992_v34 = vpop.f32.mrf.mxu0 }
 0x3e1   :  { %v527_v35 = vmax.f32 %v518_v32, 0.0 }
 0x3e2   :  { %v522_v36 = vpop.f32.mrf.mxu0 }
 0x3e3   :  { %v523_v38 = vadd.f32 %v522_v36, %v436_v20  ;;  %v557_v39 = vrot.slane %v527_v35, 2  ;;  %v553_v40 = vrot.slane %v527_v35, 1  ;;  %v562_v46 = vrot.slane %v527_v35, 3 }
 0x3e4   :  { %v995_v41 = vpop.f32.mrf.mxu0  ;;  %v544_v49 = vrot.slane %v527_v35, 4 }
 0x3e5   :  { %v528_v42 = vmax.f32 %v523_v38, 0.0  ;;  %558 = vrot.lane.b32.xlu0 %v557_v39, %s1050_s7  ;;  %554 = vrot.lane.b32.xlu1 %v553_v40, %s1052_s0  ;;  %v795_v40 = vld [vmem:[%s1358_s6 + $0x10] sm:$0xff]  ;;  %v794_v41 = vld [vmem:[%s1358_s6 + $0x8] sm:$0xff] }
 0x3e6   :  { %v545_v52 = vsel %vm252_vm8, %v543_v51, %v544_v49 }
 0x3e7   :  { %v563_v44 = vrot.slane %v528_v42, 3  ;;  %v568_v47 = vrot.slane %v528_v42, 4  ;;  %v793_v42 = vld [vmem:[%s1358_s6] sm:$0xff] }
 0x3e9   :  { %539 = vrot.lane.b32.xlu1 %v538_v45, %s1053_s3  ;;  %v564_v48 = vsel %vm375_vm9, %v562_v46, %v563_v44  ;;  %v569_v50 = vsel %vm252_vm8, %v544_v49, %v568_v47 }
 0x3ea   :  { %565 = vrot.lane.b32.xlu0 %v564_v48, %s1053_s3  ;;  %s1058_s3 = smov 60  }
 0x3ed   :  { %586 = vrot.lane.b32.xlu1 %v1163_v33, %s1055_s26 }
 0x3ee   :  { %570 = vrot.lane.b32.xlu0 %v569_v50, %s1049_s2 }
 0x3f2   :  { %546 = vrot.lane.b32.xlu0 %v545_v52, %s1049_s2 }
 0x445   :  { %v532_v53 = vpop.permute.xlu1 %531 }
 0x446   :  { %v549_v0 = vsel %vm84_vm2, %v526_v24, %v532_v53 }
 0x449   :  { %v536_v54 = vpop.permute.xlu1 %535 }
 0x44a   :  { %v550_v1 = vsel %vm204_vm5, %v549_v0, %v536_v54 }
 0x457   :  { %v559_v55 = vpop.permute.xlu0 %558  ;;  %v555_v56 = vpop.permute.xlu1 %554 }
 0x458   :  { %v573_v57 = vsel %vm84_vm2, %v527_v35, %v555_v56  ;;  %v887_v56 = vlaneseq }
 0x459   :  { %v574_v59 = vsel %vm204_vm5, %v573_v57, %v559_v55 }
 0x45b   :  { %v540_v62 = vpop.permute.xlu1 %539 }
 0x45c   :  { %v566_v58 = vpop.permute.xlu0 %565  ;;  %v551_v2 = vsel %vm389_vm10, %v550_v1, %v540_v62 }
 0x45d   :  { %v575_v60 = vsel %vm389_vm10, %v574_v59, %v566_v58  ;;  %v888_v58 = vand.u32 127, %v887_v56 }
 0x45f   :  { %v587_v9 = vpop.permute.xlu1 %586  ;;  %vm889_vm0 = vcmp.lt.s32.totalorder %v888_v58, 8 }
 0x460   :  { %v571_v61 = vpop.permute.xlu0 %570 }
 0x461   :  { %v576_v63 = vsel %vm207_vm6, %v575_v60, %v571_v61 }
 0x462   :  { %v578_v3 = vrot.slane %v576_v63, 4 }
 0x464   :  { %v547_v4 = vpop.permute.xlu0 %546 }
 0x465   :  { %v552_v5 = vsel %vm207_vm6, %v551_v2, %v547_v4 }
 0x466   :  { %v580_v6 = vsel %vm375_vm9, %v552_v5, %v578_v3 }
 0x467   :  { %1006 = vmatprep.mubr.msk.f32.mxu0 %vm589_vm12, %v580_v6 }
 0x468   :  { %1007 = vmatmul.mubr.msk.f32.vlgmr.msra.gmra.mxu0 %vm589_vm12, %v578_v3 }
 0x469   :  { %1026 = vmatprep.mubr.msk.f32.mxu0 %vm1048_vm4, %v1047_v27  ;;  %1019 = vmatpush3.msra.mxu0 %v796_v19 }
 0x46a   :  { %1020 = vmatprep.subr.mxu0 %v1047_v27 }
 0x46b   :  { %1021 = vmatpush3.msra.mxu0 %v795_v40 }
 0x46c   :  { %1022 = vmatprep.subr.mxu0 %v1047_v27 }
 0x46d   :  { %1023 = vmatpush3.msra.mxu0 %v794_v41 }
 0x46e   :  { %1024 = vmatprep.subr.mxu0 %v1047_v27 }
 0x46f   :  { %1025 = vmatpush3.msra.mxu0 %v793_v42 }
 0x528   :  { %v1008_v11 = vpop.f32.mrf.mxu0 }
 0x529   :  { %v667_v12 = vadd.f32 %v1008_v11, %v587_v9 }
 0x52a   :  { %v661_v13 = vpop.f32.mrf.mxu0 }
 0x52b   :  { %v671_v14 = vmax.f32 %v667_v12, 0.0  ;;  %v662_v15 = vadd.f32 %v661_v13, %v587_v9 }
 0x52d   :  { %v670_v16 = vmax.f32 %v662_v15, 0.0  ;;  %v699_v17 = vrot.slane %v671_v14, 4  ;;  %v695_v18 = vrot.slane %v671_v14, 3 }
 0x52f   :  { %700 = vrot.lane.b32.xlu1 %v699_v17, %s1050_s7  ;;  %696 = vrot.lane.b32.xlu0 %v695_v18, %s1056_s11  ;;  %v677_v20 = vrot.slane %v670_v16, 2  ;;  %v673_v21 = vrot.slane %v670_v16, 1  ;;  %v685_v22 = vrot.slane %v670_v16, 4  ;;  %v681_v23 = vrot.slane %v670_v16, 3 }
 0x533   :  { %678 = vrot.lane.b32.xlu1 %v677_v20, %s1052_s0  ;;  %674 = vrot.lane.b32.xlu0 %v673_v21, %s1046_s15 }
 0x537   :  { %686 = vrot.lane.b32.xlu1 %v685_v22, %s1050_s7  ;;  %682 = vrot.lane.b32.xlu0 %v681_v23, %s1056_s11 }
 0x53b   :  { %712 = vrot.lane.b32.xlu0 %v1163_v33, %s1057_s5  ;;  %797 = vrot.lane.b32.xlu1 %v1163_v33, %s1058_s3 }
 0x5a1   :  { %v701_v24 = vpop.permute.xlu1 %700  ;;  %v697_v25 = vpop.permute.xlu0 %696 }
 0x5a5   :  { %v679_v26 = vpop.permute.xlu1 %678  ;;  %v675_v28 = vpop.permute.xlu0 %674 }
 0x5a6   :  { %v689_v29 = vsel %vm46_vm1, %v670_v16, %v675_v28 }
 0x5a7   :  { %v690_v30 = vsel %vm84_vm2, %v689_v29, %v679_v26  ;;  %vm891_vm2 = vcmask 123904  }
 0x5a8   :  { %v703_v31 = vsel %vm691_vm13, %v690_v30, %v697_v25 }
 0x5a9   :  { %v687_v32 = vpop.permute.xlu1 %686  ;;  %v704_v34 = vsel %vm204_vm5, %v703_v31, %v701_v24  ;;  %v683_v35 = vpop.permute.xlu0 %682 }
 0x5aa   :  { %v706_v36 = vrot.slane %v704_v34, 4  ;;  %v692_v37 = vsel %vm691_vm13, %v690_v30, %v683_v35 }
 0x5ab   :  { %v693_v38 = vsel %vm204_vm5, %v692_v37, %v687_v32 }
 0x5ac   :  { %v708_v39 = vsel %vm429_vm11, %v693_v38, %v706_v36 }
 0x5ad   :  { %1016 = vmatmul.mubr.msk.f32.vlgmr.msra.gmra.mxu1 %vm715_vm14, %v708_v39  ;;  %v713_v43 = vpop.permute.xlu0 %712  ;;  %v798_v48 = vpop.permute.xlu1 %797 }
 0x66d   :  { %v788_v44 = vpop.f32.mrf.mxu1 }
 0x66e   :  { %v789_v45 = vadd.f32 %v788_v44, %v713_v43 }
 0x66f   :  { %v1017_v46 = vpop.f32.mrf.mxu1 }
 0x670   :  { %v792_v47 = vmax.f32 %v789_v45, 0.0 }
 0x672   :  { %1027 = vmatmul.mubr.msk.f32.vlgmr.msra.gmra.mxu0 %vm207_vm6, %v792_v47 }
 0x732   :  { %v869_v49 = vpop.f32.mrf.mxu0 }
 0x733   :  { %v870_v50 = vadd.f32 %v869_v49, %v798_v48 }
 0x734   :  { %v1028_v51 = vpop.f32.mrf.mxu0 }
 0x735   :  { %v874_v52 = vmin.f32 %v870_v50, 20.0  ;;  %vm873_vm1 = vcmp.gt.f32.partialorder %v870_v50, 20.0 }
 0x737   :  { %v875_v53 = vmul.f32 1.442695, %v874_v52 }
 0x739   :  { %1042 = vpow2.f32 %v875_v53 }
 0x746   :  { %v1043_v54 = vpop.eup %1042 }
 0x747   :  { %v877_v27 = vadd.f32 1.0, %v1043_v54  ;;  %v880_v55 = vmul.f32 -0.5, %v1043_v54  ;;  %v883_v57 = vand.u32 2147483647, %v1043_v54 }
 0x749   :  { %1044 = vlog2.f32 %v877_v27  ;;  %v881_v33 = vadd.f32 1.0, %v880_v55  ;;  %vm884_vm15 = vcmp.lt.f32.partialorder %v883_v57, 0.0004427343 }
 0x74b   :  { %v882_v61 = vmul.f32 %v1043_v54, %v881_v33 }
 0x756   :  { %v1045_v59 = vpop.eup %1044 }
 0x757   :  { %v879_v60 = vmul.f32 0.6931472, %v1045_v59 }
 0x759   :  { %v885_v62 = vsel %vm884_vm15, %v882_v61, %v879_v60 }
 0x75a   :  { %v886_v63 = vsel %vm873_vm1, %v870_v50, %v885_v62 }
 0x75b   :  { %v890_v0 = vsel %vm889_vm0, %v870_v50, %v886_v63 }
 0x75c   :  { %892 = vst.msk [vmem:[%s1359_s8] sm:$0x3] %vm891_vm2, %v890_v0 }

</bundles_post_ra>
